<compile_context>
chip_gen: v7x
topology: tpu7x:2x2x1
jax: 0.10.0
libtpu: 0.0.40
codegen_flags: <defaults>
</compile_context>

<pallas_src>
import functools

import jax
import jax.numpy as jnp
from jax.experimental import pallas as pl
from jax.experimental.pallas import tpu as pltpu

HIDDEN = 32
NEG_SLOPE = 0.01          # F.leaky_relu default
_TB_MAX = 8192            # batch tile (lane axis); multiple of 512


def _round_up(n, m):
    return ((n + m - 1) // m) * m


def _leaky_relu(x):
    return jnp.where(x > 0, x, NEG_SLOPE * x)


def policy_net_kernel(xt_ref, w_ref, b_ref, means_t_ref, *, s_pad, hidden, a_pad):
    """One batch tile, transposed formulation: all tensors are (features, batch).

    xt_ref      : (s_pad, TB)                  compute dtype (bf16/f32), x^T
    w_ref       : (2H + A_pad, max(s_pad, H))  packed [W1^T; W2^T; W3^T] (zero-padded)
    b_ref       : (max(H, A_pad), 3) f32       columns = [b1, b2, b3] (zero-padded)
    means_t_ref : (A_pad, TB) f32              tanh(fc3), transposed (lane-dense)
    """
    cdt = w_ref.dtype
    xt = xt_ref[...]                                       # (s_pad, TB)

    # Whole (tiny) parameter buffers loaded once; static value slices after.
    w = w_ref[...]
    b = b_ref[...]
    w1t = w[:hidden, :s_pad]                               # (H, s_pad)
    w2t = w[hidden:2 * hidden, :hidden]                    # (H, H)
    w3t = w[2 * hidden:2 * hidden + a_pad, :hidden]        # (A_pad, H)
    b1 = b[:hidden, 0:1]                                   # (H, 1) f32
    b2 = b[:hidden, 1:2]                                   # (H, 1) f32
    b3 = b[:a_pad, 2:3]                                    # (A_pad, 1) f32

    # fc1 + leaky_relu   (MXU: M=H, K=s_pad, N=TB -> batch on the lane axis)
    h = jnp.dot(w1t, xt, preferred_element_type=jnp.float32) + b1
    h = _leaky_relu(h)

    # fc2 + leaky_relu
    h = jnp.dot(w2t, h.astype(cdt), preferred_element_type=jnp.float32) + b2
    h = _leaky_relu(h)

    # fc3 + tanh. Padded rows of W3^T / b3 are zero -> tanh(0)=0 in padded
    # output rows, which the wrapper discards. Output is already lane-dense
    # (A_pad, TB): no transpose needed.
    z = jnp.dot(w3t, h.astype(cdt), preferred_element_type=jnp.float32) + b3
    means_t_ref[...] = jnp.tanh(z).astype(means_t_ref.dtype)


def pack_params(params, *, compute_dtype=jnp.bfloat16):
    """Pre-transpose / pad / pack parameters ONCE (outside the forward pass)."""
    w1, b1, w2, b2, w3, b3, log_sigma = params
    S, H = w1.shape
    A = w3.shape[1]
    s_pad = _round_up(S, 8)
    a_pad = _round_up(A, 8)
    kcols = max(s_pad, H)

    w_packed = jnp.zeros((2 * H + a_pad, kcols), compute_dtype)
    w_packed = w_packed.at[:H, :S].set(w1.T.astype(compute_dtype))
    w_packed = w_packed.at[H:2 * H, :H].set(w2.T.astype(compute_dtype))
    w_packed = w_packed.at[2 * H:2 * H + A, :H].set(w3.T.astype(compute_dtype))

    brows = max(H, a_pad)
    b_packed = jnp.zeros((brows, 3), jnp.float32)
    b_packed = b_packed.at[:H, 0].set(jnp.reshape(b1, (H,)).astype(jnp.float32))
    b_packed = b_packed.at[:H, 1].set(jnp.reshape(b2, (H,)).astype(jnp.float32))
    b_packed = b_packed.at[:A, 2].set(jnp.reshape(b3, (A,)).astype(jnp.float32))

    # sigmas is batch-independent: precompute exp(log_sigma) here, never in-kernel.
    sigma_row = jnp.exp(jnp.reshape(log_sigma, (1, A)).astype(jnp.float32))

    meta = dict(S=S, H=H, A=A, s_pad=s_pad, a_pad=a_pad)
    return dict(w=w_packed, b=b_packed, sigma=sigma_row, meta=meta)


def policy_net_forward_packed(x, packed, *, tb_max=_TB_MAX):
    """Forward with pre-packed params. Returns (means, sigmas), each (B, A) f32."""
    meta = packed["meta"]
    S, H, A = meta["S"], meta["H"], meta["A"]
    s_pad, a_pad = meta["s_pad"], meta["a_pad"]
    w_packed, b_packed = packed["w"], packed["b"]
    compute_dtype = w_packed.dtype

    B = x.shape[0]
    assert x.shape[1] == S, f"expected state_size={S}, got {x.shape[1]}"

    # --- batch tile geometry: batch lives on the 128-lane axis ---------------
    b128 = _round_up(B, 128)
    if b128 <= tb_max:
        tb = b_pad = b128            # single tile (block == full array dims)
    else:
        tb = tb_max
        b_pad = _round_up(B, tb)
    grid = (b_pad // tb,)

    # --- x^T: transpose + pad + cast in one shot ------------------------------
    if (s_pad, b_pad) == (S, B):
        xt = x.T.astype(compute_dtype)
    else:
        xt = jnp.zeros((s_pad, b_pad), compute_dtype).at[:S, :B].set(
            x.T.astype(compute_dtype))

    kernel = functools.partial(policy_net_kernel,
                               s_pad=s_pad, hidden=H, a_pad=a_pad)

    itemsize = jnp.dtype(compute_dtype).itemsize
    cost = pl.CostEstimate(
        flops=2 * b_pad * (s_pad * H + H * H + H * a_pad),
        transcendentals=b_pad * a_pad,
        bytes_accessed=(s_pad * b_pad * itemsize          # x^T read
                        + int(w_packed.size) * itemsize   # weights
                        + int(b_packed.size) * 4          # biases
                        + a_pad * b_pad * 4),             # means^T write
    )

    means_t = pl.pallas_call(
        kernel,
        out_shape=jax.ShapeDtypeStruct((a_pad, b_pad), jnp.float32),
        grid=grid,
        in_specs=[
            pl.BlockSpec((s_pad, tb), lambda i: (0, i)),          # x^T tile (lane-dense)
            pl.BlockSpec(w_packed.shape, lambda i: (0, 0)),       # weights (resident)
            pl.BlockSpec(b_packed.shape, lambda i: (0, 0)),       # biases (resident)
        ],
        out_specs=pl.BlockSpec((a_pad, tb), lambda i: (0, i)),    # means^T (lane-dense)
        compiler_params=pltpu.CompilerParams(
            dimension_semantics=("parallel",)),                   # batch axis independent
        cost_estimate=cost,
    )(xt, w_packed, b_packed)

    means = means_t[:A, :B].T                                     # (B, A) f32
    sigmas = jnp.broadcast_to(packed["sigma"], (B, A))
    return means, sigmas


def policy_net_forward(x, params, *, compute_dtype=jnp.bfloat16, tb_max=_TB_MAX):
    """Convenience wrapper: packs params then runs the kernel.

    In a real deployment call pack_params() once and reuse the packed tree.
    """
    packed = pack_params(params, compute_dtype=compute_dtype)
    return policy_net_forward_packed(x, packed, tb_max=tb_max)


def init_params(key, state_size, action_size, hidden_size=HIDDEN):
    """Deterministic synthetic parameters (shapes match the PyTorch module)."""
    k1, k2, k3, k4, k5, k6 = jax.random.split(key, 6)
    w1 = jax.random.normal(k1, (state_size, hidden_size), jnp.float32) * 0.1
    b1 = jax.random.normal(k2, (1, hidden_size), jnp.float32) * 0.1
    w2 = jax.random.normal(k3, (hidden_size, hidden_size), jnp.float32) * 0.1
    b2 = jax.random.normal(k4, (1, hidden_size), jnp.float32) * 0.1
    w3 = jax.random.normal(k5, (hidden_size, action_size), jnp.float32) * 0.1
    b3 = jax.random.normal(k6, (1, action_size), jnp.float32) * 0.1
    log_sigma = jnp.zeros((1, action_size), jnp.float32)  # torch.zeros(action_size)
    return (w1, b1, w2, b2, w3, b3, log_sigma)


def reference_forward(x, params):
    """Pure-JAX reference for the PyTorch module."""
    w1, b1, w2, b2, w3, b3, log_sigma = params
    h = jax.nn.leaky_relu(x @ w1 + b1, NEG_SLOPE)
    h = jax.nn.leaky_relu(h @ w2 + b2, NEG_SLOPE)
    means = jnp.tanh(h @ w3 + b3)
    sigmas = jnp.broadcast_to(jnp.exp(log_sigma), means.shape)
    return means, sigmas


if __name__ == "__main__":
    key = jax.random.PRNGKey(0)
    kx, kp = jax.random.split(key)

    batch, state_size, action_size = 8, 16, 4
    x = jax.random.normal(kx, (batch, state_size), jnp.float32)
    params = init_params(kp, state_size, action_size)
    means_ref, sigmas_ref = reference_forward(x, params)

    # Default path: bf16 MXU operands, f32 accumulate / activations.
    means, sigmas = policy_net_forward(x, params)
    jax.block_until_ready((means, sigmas))
    assert means.shape == (batch, action_size)
    assert sigmas.shape == (batch, action_size)
    assert jnp.allclose(means, means_ref, atol=2e-2), "means mismatch (bf16 path)"
    assert jnp.allclose(sigmas, sigmas_ref, atol=1e-6), "sigmas mismatch"

    # Pure f32 path: tight numerical check against the reference.
    means32, sigmas32 = policy_net_forward(x, params, compute_dtype=jnp.float32)
    jax.block_until_ready((means32, sigmas32))
    assert jnp.allclose(means32, means_ref, atol=1e-5), "means mismatch (f32 path)"
    assert jnp.allclose(sigmas32, sigmas_ref, atol=1e-6), "sigmas mismatch (f32 path)"

    # Padded + multi-tile path: B and S not multiples of 8/128, grid of 2 tiles.
    x2 = jax.random.normal(kx, (200, 12), jnp.float32)
    params2 = init_params(kp, 12, action_size)
    m2, s2 = policy_net_forward(x2, params2, compute_dtype=jnp.float32, tb_max=128)
    jax.block_until_ready((m2, s2))
    m2_ref, s2_ref = reference_forward(x2, params2)
    assert jnp.allclose(m2, m2_ref, atol=1e-5), "means mismatch (padded/tiled path)"
    assert jnp.allclose(s2, s2_ref, atol=1e-6), "sigmas mismatch (padded/tiled path)"

    print("KERNEL_OK")
</pallas_src>

<mosaic_0001>
module attributes {stable_mosaic.version = 11 : i64} {
  func.func @policy_net_kernel(%arg0: i32, %arg1: memref<16x128xbf16, #tpu.memory_space<vmem>>, %arg2: memref<72x32xbf16, #tpu.memory_space<vmem>>, %arg3: memref<32x3xf32, #tpu.memory_space<vmem>>, %arg4: memref<8x128xf32, #tpu.memory_space<vmem>>) attributes {dimension_semantics = [#tpu.dimension_semantics<parallel>], iteration_bounds = array<i64: 1>, scalar_prefetch = 0 : i64, scratch_operands = 0 : i64, tpu.core_type = #tpu.core_type<tc>, window_params = [{transform_indices = @transform_0, window_bounds = array<i64: 16, 128>}, {pipeline_mode = #tpu.pipeline_mode<synchronous>, transform_indices = @transform_1, window_bounds = array<i64: 72, 32>}, {pipeline_mode = #tpu.pipeline_mode<synchronous>, transform_indices = @transform_2, window_bounds = array<i64: 32, 3>}, {transform_indices = @transform_3, window_bounds = array<i64: 8, 128>}]} {
    %c0 = arith.constant 0 : index
    %c0_0 = arith.constant 0 : index
    %0 = vector.load %arg1[%c0, %c0_0] : memref<16x128xbf16, #tpu.memory_space<vmem>>, vector<16x128xbf16>
    %c0_1 = arith.constant 0 : index
    %c0_2 = arith.constant 0 : index
    %1 = vector.load %arg2[%c0_1, %c0_2] : memref<72x32xbf16, #tpu.memory_space<vmem>>, vector<72x32xbf16>
    %c0_3 = arith.constant 0 : index
    %c0_4 = arith.constant 0 : index
    %2 = vector.load %arg3[%c0_3, %c0_4] : memref<32x3xf32, #tpu.memory_space<vmem>>, vector<32x3xf32>
    %3 = vector.extract_strided_slice %1 {offsets = [0, 0], sizes = [32, 16], strides = [1, 1]} : vector<72x32xbf16> to vector<32x16xbf16>
    %4 = vector.extract_strided_slice %1 {offsets = [32, 0], sizes = [32, 32], strides = [1, 1]} : vector<72x32xbf16> to vector<32x32xbf16>
    %5 = vector.extract_strided_slice %1 {offsets = [64, 0], sizes = [8, 32], strides = [1, 1]} : vector<72x32xbf16> to vector<8x32xbf16>
    %6 = vector.extract_strided_slice %2 {offsets = [0, 0], sizes = [32, 1], strides = [1, 1]} : vector<32x3xf32> to vector<32x1xf32>
    %7 = vector.extract_strided_slice %2 {offsets = [0, 1], sizes = [32, 1], strides = [1, 1]} : vector<32x3xf32> to vector<32x1xf32>
    %8 = vector.extract_strided_slice %2 {offsets = [0, 2], sizes = [8, 1], strides = [1, 1]} : vector<32x3xf32> to vector<8x1xf32>
    %cst = arith.constant dense<0.000000e+00> : vector<32x128xf32>
    %9 = tpu.matmul %3, %0, %cst {dimension_numbers = #tpu.dot_dimension_numbers<[1], [0], [0], [1], [0, 0, 1, 1], [], []>} : vector<32x16xbf16>, vector<16x128xbf16>, vector<32x128xf32> -> vector<32x128xf32>
    %10 = vector.broadcast %6 : vector<32x1xf32> to vector<32x128xf32>
    %11 = arith.addf %9, %10 : vector<32x128xf32>
    %cst_5 = arith.constant 0.000000e+00 : f32
    %12 = vector.broadcast %cst_5 : f32 to vector<32x128xf32>
    %13 = arith.cmpf ogt, %11, %12 : vector<32x128xf32>
    %cst_6 = arith.constant 0.00999999977 : f32
    %14 = vector.broadcast %cst_6 : f32 to vector<32x128xf32>
    %15 = arith.mulf %14, %11 : vector<32x128xf32>
    %16 = arith.select %13, %11, %15 : vector<32x128xi1>, vector<32x128xf32>
    %17 = arith.truncf %16 : vector<32x128xf32> to vector<32x128xbf16>
    %cst_7 = arith.constant dense<0.000000e+00> : vector<32x128xf32>
    %18 = tpu.matmul %4, %17, %cst_7 {dimension_numbers = #tpu.dot_dimension_numbers<[1], [0], [0], [1], [0, 0, 1, 1], [], []>} : vector<32x32xbf16>, vector<32x128xbf16>, vector<32x128xf32> -> vector<32x128xf32>
    %19 = vector.broadcast %7 : vector<32x1xf32> to vector<32x128xf32>
    %20 = arith.addf %18, %19 : vector<32x128xf32>
    %cst_8 = arith.constant 0.000000e+00 : f32
    %21 = vector.broadcast %cst_8 : f32 to vector<32x128xf32>
    %22 = arith.cmpf ogt, %20, %21 : vector<32x128xf32>
    %cst_9 = arith.constant 0.00999999977 : f32
    %23 = vector.broadcast %cst_9 : f32 to vector<32x128xf32>
    %24 = arith.mulf %23, %20 : vector<32x128xf32>
    %25 = arith.select %22, %20, %24 : vector<32x128xi1>, vector<32x128xf32>
    %26 = arith.truncf %25 : vector<32x128xf32> to vector<32x128xbf16>
    %cst_10 = arith.constant dense<0.000000e+00> : vector<8x128xf32>
    %27 = tpu.matmul %5, %26, %cst_10 {dimension_numbers = #tpu.dot_dimension_numbers<[1], [0], [0], [1], [0, 0, 1, 1], [], []>} : vector<8x32xbf16>, vector<32x128xbf16>, vector<8x128xf32> -> vector<8x128xf32>
    %28 = vector.broadcast %8 : vector<8x1xf32> to vector<8x128xf32>
    %29 = arith.addf %27, %28 : vector<8x128xf32>
    %30 = math.tanh %29 : vector<8x128xf32>
    %c0_11 = arith.constant 0 : index
    %c0_12 = arith.constant 0 : index
    %31 = vector.load %arg4[%c0_11, %c0_12] : memref<8x128xf32, #tpu.memory_space<vmem>>, vector<8x128xf32>
    tpu.vector_store %arg4[%c0_11, %c0_12], %30 {strides = array<i32>} : memref<8x128xf32, #tpu.memory_space<vmem>>, vector<8x128xf32>,
    return
  }
  func.func @transform_0(%arg0: i32) -> (i32, i32) {
    %c0_i32 = arith.constant 0 : i32
    %c0_i32_0 = arith.constant 0 : i32
    return %c0_i32, %arg0 : i32, i32
  }
  func.func @transform_1(%arg0: i32) -> (i32, i32) {
    %c0_i32 = arith.constant 0 : i32
    %c0_i32_0 = arith.constant 0 : i32
    %c0_i32_1 = arith.constant 0 : i32
    return %c0_i32, %c0_i32_0 : i32, i32
  }
  func.func @transform_2(%arg0: i32) -> (i32, i32) {
    %c0_i32 = arith.constant 0 : i32
    %c0_i32_0 = arith.constant 0 : i32
    %c0_i32_1 = arith.constant 0 : i32
    return %c0_i32, %c0_i32_0 : i32, i32
  }
  func.func @transform_3(%arg0: i32) -> (i32, i32) {
    %c0_i32 = arith.constant 0 : i32
    %c0_i32_0 = arith.constant 0 : i32
    return %c0_i32, %arg0 : i32, i32
  }
}

</mosaic_0001>

<bundles_post_ra>
// kernel: tpu_custom_call.1
= control target key start
LH: loop header
LB: loop body
LE: loop exit
PB: predicated region body
PF: predicated region fallthrough
CT: control target
= control target key end

     0   :  { %vm67_vm0 = vcmask 130048   ;;  %v381_v3 = vmov 0   ;;  %s452_s0 = inlined_call_operand.vmem [shape: bf16[16,128], index: 0, kind: input, shape index: {}]   ;;  %s453_s1 = inlined_call_operand.vmem [shape: bf16[72,32], index: 1, kind: input, shape index: {}]   ;;  %s454_s2 = inlined_call_operand.vmem [shape: f32[32,3], index: 2, kind: input, shape index: {}]   ;;  %s455_s3 = inlined_call_operand.hbm [shape: f32[8,128], index: 3, kind: output, shape index: {}]  }
   0x1   :  { %v350_v0 = vld [vmem:[%s452_s0] sm:$0xff]   ;;  %v352_v2 = vld [vmem:[%s453_s1 + $0x8] sm:$0xff]   ;;  %344 = vset.pattern.permute.xlu0 %v381_v3  ;;  %v29_v5 = vld [vmem:[%s454_s2 + $0x10] sm:$0xff]  ;;  %345 = vset.pattern.permute.xlu1 %v381_v3 }
   0x2   :  { %v351_v1 = vld [vmem:[%s453_s1] sm:$0xff]   ;;  %316 = vmatprep.subr.bf16.mxu0 %v350_v0  ;;  %v28_v6 = vld [vmem:[%s454_s2 + $0x8] sm:$0xff]  ;;  %43 = vperm.xlu1 %345, %v29_v5  }
   0x3   :  { %317 = vmatpush3.bf16.msra.mxu0 %v350_v0  ;;  %318 = vmatprep.mubr.msk.bf16.mxu0 %vm67_vm0, %v351_v1  ;;  %v27_v4 = vld [vmem:[%s454_s2] sm:$0xff] }
   0x4   :  { %33 = vperm.xlu0 %344, %v27_v4  }
   0x5   :  { %8 = vsyncpa [#allocation3], 0  ;;  %v30_v7 = vld [vmem:[%s454_s2 + $0x18] sm:$0xff]  ;;  %v353_v8 = vld [vmem:[%s453_s1 + $0x10] sm:$0xff]   ;;  %vm163_vm1 = vcmask 261120   ;;  %v382_v9 = vmov 1  }
   0x6   :  { %319 = vmatmul.mubr.msk.bf16.vlgmr.msra.gmra.mrb[0].mxu0 %vm67_vm0, %v352_v2  ;;  %48 = vperm.xlu1 %345, %v30_v7   ;;  %v354_v32 = vld [vmem:[%s453_s1 + $0x18] sm:$0xff]   ;;  %v383_v33 = vmov 0.0   ;;  %vm384_vm6 = vmmov 0   ;;  %v385_v34 = vmov 2   ;;  %v26_v57 = vld [vmem:[%s453_s1 + $0x20] sm:$0xf] }
   0x7   :  { %326 = vmatprep.mubr.msk.bf16.mxu1 %vm163_vm1, %v353_v8  ;;  %330 = vmatprep.subr.bf16.mxu0 %v383_v33  ;;  %s386_s30 = smov [#allocation2]  }
   0x8   :  { %38 = vperm.xlu0 %344, %v28_v6   ;;  %334 = vmatprep.mubr.msk.bf16.mxu0 %vm384_vm6, %v383_v33  ;;  %s288_s4 = sshll.u32 %s386_s30, 4  ;;  %s289_s4 = int_to_ptr.vmem [resolvable:$true] %s288_s4 }
   0x9   :  { %s357_s5 = scalar_lea.vmem %s289_s4, 128  ;;  %p362_p1 = scmp.lt.s32.totalorder %s289_s4, %s289_s4 }
   0xa   :  { %347 = vset.pattern.permute.xlu1 %v382_v9  ;;  %p358_p0 = scmp.ne.s32.totalorder %s289_s4, %s357_s5  ;;  %p363_p2 = scmp.lt.s32.totalorder %s357_s5, %s357_s5 }
   0xb   :  { %142 = vperm.xlu1 %347, %v28_v6  }
   0xc   :  { %346 = vset.pattern.permute.xlu0 %v382_v9  ;;  %p364_p3 = por %p363_p2, %p362_p1 }
   0xd   :  { %138 = vperm.xlu0 %346, %v27_v4  }
   0xe   :  { %p365_p4 = pnand %p364_p3, %p358_p0 }
   0xf   :  { %146 = vperm.xlu1 %347, %v29_v5  }
  0x11   :  { %150 = vperm.xlu0 %346, %v30_v7  }
  0x13   :  { %348 = vset.pattern.permute.xlu1 %v385_v34 }
  0x14   :  { %234 = vperm.xlu1 %348, %v27_v4  }
  0x15   :  { %349 = vset.pattern.permute.xlu0 %v385_v34 }
  0x81   :  { %v44_v10 = vpop.permute.xlu1 %43 }
  0x83   :  { %v34_v11 = vpop.permute.xlu0 %33 }
  0x85   :  { %v49_v13 = vpop.permute.xlu1 %48 }
  0x87   :  { %v39_v18 = vpop.permute.xlu0 %38 }
  0x8a   :  { %v143_v35 = vpop.permute.xlu1 %142 }
  0x8c   :  { %v139_v36 = vpop.permute.xlu0 %138 }
  0x8e   :  { %v147_v37 = vpop.permute.xlu1 %146 }
  0x90   :  { %v151_v39 = vpop.permute.xlu0 %150 }
  0x93   :  { %v235_v58 = vpop.permute.xlu1 %234 }
  0xd9   :  { %v320_v12 = vpop.f32.mrb[0].mxu0 }
  0xda   :  { %v117_v14 = vadd.f32 %v320_v12, %v44_v10  ;;  %v108_v15 = vpop.f32.mrb[1].mxu0 }
  0xdb   :  { %v109_v16 = vadd.f32 %v108_v15, %v34_v11  ;;  %v321_v17 = vpop.f32.mrb[2].mxu0 }
  0xdc   :  { %v129_v19 = vmul.f32 0.01, %v117_v14  ;;  %v120_v20 = vadd.f32 %v321_v17, %v49_v13  ;;  %v111_v21 = vpop.f32.mrb[3].mxu0  ;;  %vm125_vm2 = vcmp.gt.f32.partialorder %v117_v14, 0.0 }
  0xdd   :  { %v127_v22 = vmul.f32 0.01, %v109_v16  ;;  %v112_v23 = vadd.f32 %v111_v21, %v39_v18  ;;  %vm123_vm4 = vcmp.gt.f32.partialorder %v109_v16, 0.0 }
  0xde   :  { %vm126_vm3 = vcmp.gt.f32.partialorder %v120_v20, 0.0  ;;  %v130_v24 = vmul.f32 0.01, %v120_v20  ;;  %v133_v26 = vsel %vm125_vm2, %v117_v14, %v129_v19 }
  0xdf   :  { %v128_v25 = vmul.f32 0.01, %v112_v23  ;;  %vm124_vm5 = vcmp.gt.f32.partialorder %v112_v23, 0.0  ;;  %v131_v28 = vsel %vm123_vm4, %v109_v16, %v127_v22 }
  0xe0   :  { %v134_v27 = vsel %vm126_vm3, %v120_v20, %v130_v24 }
  0xe1   :  { %v132_v29 = vsel %vm124_vm5, %v112_v23, %v128_v25  ;;  %v136_v30 = vpack.c.bf16 %v134_v27, %v133_v26 }
  0xe2   :  { %v135_v31 = vpack.c.bf16 %v132_v29, %v131_v28 }
  0xe4   :  { %322 = vmatprep.subr.bf16.mxu1 %v135_v31 }
  0xe5   :  { %323 = vmatpush3.bf16.msra.mxu1 %v135_v31 }
  0xe6   :  { %324 = vmatprep.subr.bf16.mxu1 %v136_v30 }
  0xe9   :  { %325 = vmatpush3.bf16.msra.mxu1 %v136_v30 }
  0xec   :  { %327 = vmatmul.mubr.msk.bf16.vlgmr.msra.gmra.mrb[0].mxu1 %vm163_vm1, %v354_v32 }
 0x1bf   :  { %v328_v38 = vpop.f32.mrb[0].mxu1 }
 0x1c0   :  { %v213_v40 = vadd.f32 %v328_v38, %v147_v37  ;;  %v204_v41 = vpop.f32.mrb[1].mxu1 }
 0x1c1   :  { %v205_v42 = vadd.f32 %v204_v41, %v139_v36  ;;  %v329_v43 = vpop.f32.mrb[2].mxu1 }
 0x1c2   :  { %v225_v44 = vmul.f32 0.01, %v213_v40  ;;  %v216_v45 = vadd.f32 %v329_v43, %v151_v39  ;;  %v207_v46 = vpop.f32.mrb[3].mxu1  ;;  %vm221_vm7 = vcmp.gt.f32.partialorder %v213_v40, 0.0 }
 0x1c3   :  { %v223_v47 = vmul.f32 0.01, %v205_v42  ;;  %v208_v48 = vadd.f32 %v207_v46, %v143_v35  ;;  %vm219_vm8 = vcmp.gt.f32.partialorder %v205_v42, 0.0 }
 0x1c4   :  { %vm222_vm9 = vcmp.gt.f32.partialorder %v216_v45, 0.0  ;;  %v226_v49 = vmul.f32 0.01, %v216_v45  ;;  %v229_v51 = vsel %vm221_vm7, %v213_v40, %v225_v44 }
 0x1c5   :  { %vm220_vm10 = vcmp.gt.f32.partialorder %v208_v48, 0.0  ;;  %v224_v50 = vmul.f32 0.01, %v208_v48  ;;  %v227_v53 = vsel %vm219_vm8, %v205_v42, %v223_v47 }
 0x1c6   :  { %v230_v52 = vsel %vm222_vm9, %v216_v45, %v226_v49 }
 0x1c7   :  { %v232_v54 = vpack.c.bf16 %v230_v52, %v229_v51  ;;  %v228_v55 = vsel %vm220_vm10, %v208_v48, %v224_v50 }
 0x1c8   :  { %v231_v56 = vpack.c.bf16 %v228_v55, %v227_v53 }
 0x1ca   :  { %331 = vmatpush3.bf16.msra.mxu0 %v231_v56 }
 0x1cb   :  { %332 = vmatprep.subr.bf16.mxu0 %v383_v33 }
 0x1ce   :  { %333 = vmatpush3.bf16.msra.mxu0 %v232_v54 }
 0x1d1   :  { %335 = vmatmul.mubr.msk.bf16.vlgmr.msra.gmra.mrb[4].mxu0 %vm163_vm1, %v26_v57 }
 0x2a4   :  { %v274_v59 = vpop.f32.mrb[4].mxu0 }
 0x2a5   :  { %v275_v60 = vadd.f32 %v274_v59, %v235_v58  ;;  %v336_v61 = vpop.f32.mrb[5].mxu0 }
 0x2a6   :  { %v277_v62 = vpop.f32.mrb[6].mxu0 }
 0x2a7   :  { %355 = vtanh.f32 %v275_v60  ;;  %v337_v63 = vpop.f32.mrb[7].mxu0 }
 0x2b1   :  { %v356_v0 = vpop.eup %355 }
 0x2b2   :  { %281 = vst [vmem:[#allocation2] sm:$0xff] %v356_v0 }
 0x2b3   :  { %368 = shalt.err (!%p365_p4)
}
 0x2b4   :  { %s369_s7 = scalar_lea.hbm %s455_s3, 128 }
 0x2b5   :  { %p370_p5 = scmp.ne.s32.totalorder %s455_s3, %s369_s7  ;;  %p373_p6 = scmp.lt.u32.totalorder %s369_s7, %s455_s3 }
 0x2b7   :  { %p375_p7 = pnand %p373_p6, %p370_p5 }
 0x2b9   :  { %378 = shalt.err (!%p375_p7)
}
 0x2ba   :  { %291 = dma.vmem_to_hbm [thread:$0]  %s289_s4, 128, %s455_s3, [#allocation3]  }
 0x2bb   :  { %379 = dma.done.wait [#allocation3], 128  }
 0x2bc   :  { %380 = vsyncadd [#allocation3], 4294967168 }
 0x2bd   :  { %295 = vsyncpa [#allocation3], 1 }

</bundles_post_ra>
